<compile_context>
chip_gen: v7x
topology: tpu7x:2x2x1
jax: 0.10.0
libtpu: 0.0.40
codegen_flags: <defaults>
</compile_context>

<pallas_src>
import math
import functools

import jax
import jax.numpy as jnp
from jax import lax
from jax.experimental import pallas as pl
from jax.experimental.pallas import tpu as pltpu


def _round_up(x, m):
    return ((x + m - 1) // m) * m


def _dot_attn_kernel(span_ref, cand_ref, feat_ref, sexp_ref, a1_ref, a2_ref,
                     w2sel_ref, a3_ref, a4_ref, ls_ref, we_ref,
                     *, num_cands, padded_cands, approx_recip):
    """One tile of TN flattened (batch, span) rows.

    span_ref : (TN, E)        span representations (any float dtype)
    cand_ref : (TN, C*E)      flattened candidate embeddings (lane-dense)
    feat_ref : (TN, F)  f32   [mask (Cp) | prior (Cp) | 1.0 | zero pad]
    sexp_ref : (E,  C*E) f32  span -> per-candidate replication selector
    a1_ref   : (C*E, C*Hp)    selector * w1[:,0]/sqrt(E)   (score path)
    a2_ref   : (F,  C*Hp)     selector * w1[:,1] (prior) + b1 (+ spare unit)
    w2sel_ref: (C*Hp, Cp)     selector * w2 (+ b2 on the spare unit)
    a3_ref   : (Cp, C*E)      candidate -> E-replication selector
    a4_ref   : (C*E, E)       per-candidate E-segment fold selector
    """
    f32 = jnp.float32
    span = span_ref[...].astype(f32)                       # (TN, E)
    cand = cand_ref[...].astype(f32)                       # (TN, C*E)
    feat = feat_ref[...]                                   # (TN, F)

    # --- <span, candidate>: replicate span across candidates on the MXU, then
    #     one full-lane VPU multiply.  No (TN, C, E) block is ever formed.
    span_rep = jnp.dot(span, sexp_ref[...], preferred_element_type=f32)   # (TN, C*E)
    prod = span_rep * cand                                                # (TN, C*E)

    # --- fused E-segment reduce + MLP layer 1 (scale, w1, b1 folded into A1/A2)
    pre = (jnp.dot(prod, a1_ref[...], preferred_element_type=f32)
           + jnp.dot(feat, a2_ref[...], preferred_element_type=f32))      # (TN, C*Hp)
    h = jnp.maximum(pre, 0.0)

    # --- MLP layer 2 (w2 and b2 folded into W2SEL)
    linking = jnp.dot(h, w2sel_ref[...], preferred_element_type=f32)      # (TN, Cp)

    mask = feat[:, 0:padded_cands]                          # (TN, Cp) 0/1
    lane = lax.broadcasted_iota(jnp.int32, linking.shape, 1)
    # real masked candidates -> exactly -10000 (reference semantics);
    # padded candidate lanes -> -inf so they get exactly zero softmax weight
    neg = jnp.where(lane < num_cands, -10000.0, -jnp.inf)
    ls = jnp.where(mask > 0.5, linking, neg)
    ls_ref[...] = ls.astype(ls_ref.dtype)

    # --- softmax over candidates (tiny (TN, Cp) block, single canonical layout)
    m = jnp.max(ls, axis=-1, keepdims=True)
    p = jnp.exp(ls - m)
    denom = jnp.sum(p, axis=-1, keepdims=True)
    if approx_recip:
        normed = p * pl.reciprocal(denom, approx=True)
    else:
        normed = p / denom

    # --- weighted sum of candidate embeddings, again via MXU selectors
    normed_rep = jnp.dot(normed, a3_ref[...], preferred_element_type=f32)  # (TN, C*E)
    we = jnp.dot(normed_rep * cand, a4_ref[...], preferred_element_type=f32)
    we_ref[...] = we.astype(we_ref.dtype)


def dot_attention_with_prior(span_reps, cand_embs, prior, entity_mask,
                             w1, b1, w2, b2, *, tile_n=None,
                             out_dtype=jnp.float32, approx_reciprocal=True):
    """
    span_reps:   (B, S, E)        float32 or bfloat16 (native dtype is preserved)
    cand_embs:   (B, S, C, E)     float32 or bfloat16
    prior:       (B, S, C)
    entity_mask: (B, S, C) bool
    w1: (H, 2), b1: (H,), w2: (1, H), b2: (1,)   -- PyTorch Linear layout
    returns dict(linking_scores=(B,S,C), weighted_entity_embeddings=(B,S,E))
    """
    f32 = jnp.float32
    B, S, E = span_reps.shape
    C = cand_embs.shape[2]
    H = w1.shape[0]
    N = B * S

    Cp = _round_up(max(C, 8), 8)          # sublane-aligned candidate width
    Hp = _round_up(H + 1, 128)            # +1 spare hidden unit carries b2
    CE = C * E
    CHp = C * Hp
    F = _round_up(2 * Cp + 1, 8)          # [mask | prior | 1.0 | pad]

    # ---- flattened, lane-dense inputs (native dtype preserved) --------------
    span_f = span_reps.reshape(N, E)
    cand_f = cand_embs.reshape(N, CE)     # contiguous reshape -> free
    feat = jnp.zeros((N, F), f32)
    feat = feat.at[:, 0:C].set(entity_mask.reshape(N, C).astype(f32))
    feat = feat.at[:, Cp:Cp + C].set(prior.reshape(N, C).astype(f32))
    feat = feat.at[:, 2 * Cp].set(1.0)

    # ---- constant selector / weight matrices (all MLP params folded in) -----
    w1a = w1[:, 0].astype(f32)
    w1b = w1[:, 1].astype(f32)
    col_a = jnp.zeros((Hp,), f32).at[:H].set(w1a / math.sqrt(E))
    col_b = jnp.zeros((Hp,), f32).at[:H].set(w1b)
    col_b1 = jnp.zeros((Hp,), f32).at[:H].set(b1.astype(f32)).at[H].set(1.0)
    col_w2 = (jnp.zeros((Hp,), f32).at[:H].set(w2.reshape(H).astype(f32))
              .at[H].set(b2.reshape(())[()].astype(f32)))

    eye_E = jnp.eye(E, dtype=f32)
    eye_C = jnp.eye(C, dtype=f32)
    sexp = jnp.tile(eye_E, (1, C))                                       # (E, CE)
    a1 = jnp.kron(eye_C, jnp.outer(jnp.ones((E,), f32), col_a))          # (CE, CHp)
    a2 = jnp.zeros((F, CHp), f32)
    a2 = a2.at[Cp:Cp + C, :].set(jnp.kron(eye_C, col_b[None, :]))
    a2 = a2.at[2 * Cp, :].set(jnp.tile(col_b1, C))
    w2sel = jnp.zeros((CHp, Cp), f32)
    w2sel = w2sel.at[:, :C].set(jnp.kron(eye_C, col_w2[:, None]))
    a3 = jnp.zeros((Cp, CE), f32)
    a3 = a3.at[:C, :].set(jnp.kron(eye_C, jnp.ones((1, E), f32)))
    a4 = jnp.tile(eye_E, (C, 1))                                         # (CE, E)

    # ---- tile size from a lane/sublane-padded VMEM footprint ----------------
    LANE = 128

    def lp(d):                      # lane padding of a trailing dim
        return _round_up(d, LANE)

    def vbytes(r, c, itm=4):        # padded VMEM bytes of an (r, c) array
        return _round_up(r, 8) * lp(c) * itm

    span_b = jnp.dtype(span_f.dtype).itemsize
    cand_b = jnp.dtype(cand_f.dtype).itemsize
    out_b = jnp.dtype(out_dtype).itemsize
    per_row = 2 * (lp(E) * span_b + lp(CE) * cand_b + lp(F) * 4          # dbl-buffered I/O
                   + lp(Cp) * out_b + lp(E) * out_b)
    per_row += 4 * (4 * lp(CE) + 2 * CHp + 6 * LANE)                     # f32 temporaries
    const_bytes = 2 * (vbytes(E, CE) + vbytes(CE, CHp) + vbytes(F, CHp)
                       + vbytes(CHp, Cp) + vbytes(Cp, CE) + vbytes(CE, E))
    budget = 16 * 1024 * 1024

    if tile_n is None:
        tile_n = max(16, (budget - const_bytes) // per_row)
    tile_n = max(16, min(512, (tile_n // 16) * 16))
    # v7x has 2 TensorCores: make sure the (parallel) grid has >= 2 steps.
    tile_n = min(tile_n, max(16, _round_up(-(-N // 2), 16)))
    Np = _round_up(N, tile_n)
    grid = (Np // tile_n,)

    if Np != N:                      # padded rows are fully masked, sliced off
        pad = Np - N
        span_f = jnp.pad(span_f, ((0, pad), (0, 0)))
        cand_f = jnp.pad(cand_f, ((0, pad), (0, 0)))
        feat = jnp.pad(feat, ((0, pad), (0, 0)))

    kernel = functools.partial(_dot_attn_kernel, num_cands=C,
                               padded_cands=Cp, approx_recip=approx_reciprocal)

    def row(d):
        return pl.BlockSpec((tile_n, d), lambda i: (i, 0))

    def cst(r, c):
        return pl.BlockSpec((r, c), lambda i: (0, 0))      # resident constant

    ls_p, we = pl.pallas_call(
        kernel,
        out_shape=(jax.ShapeDtypeStruct((Np, Cp), out_dtype),
                   jax.ShapeDtypeStruct((Np, E), out_dtype)),
        grid_spec=pltpu.PrefetchScalarGridSpec(
            num_scalar_prefetch=0,
            grid=grid,
            in_specs=[row(E), row(CE), row(F),
                      cst(E, CE), cst(CE, CHp), cst(F, CHp),
                      cst(CHp, Cp), cst(Cp, CE), cst(CE, E)],
            out_specs=[row(Cp), row(E)],
        ),
        compiler_params=pltpu.CompilerParams(
            dimension_semantics=("parallel",),
            vmem_limit_bytes=32 * 1024 * 1024,   # stays comfortable on v7x (64 MiB/TC)
        ),
    )(span_f, cand_f, feat, sexp, a1, a2, w2sel, a3, a4)

    return {
        "linking_scores": ls_p[:N, :C].reshape(B, S, C),
        "weighted_entity_embeddings": we[:N].reshape(B, S, E),
    }


def _reference(span_reps, cand_embs, prior, entity_mask, w1, b1, w2, b2):
    E = cand_embs.shape[-1]
    scores = jnp.sum(span_reps[..., None, :] * cand_embs, axis=-1) / math.sqrt(E)
    feat = jnp.stack([scores, prior], axis=-1)                       # (B,S,C,2)
    h = jax.nn.relu(feat @ w1.T + b1)                                # (B,S,C,H)
    linking = (h @ w2.T + b2)[..., 0]                                # (B,S,C)
    ls = jnp.where(entity_mask, linking, -10000.0)
    normed = jax.nn.softmax(ls, axis=-1)
    we = jnp.sum(normed[..., None] * cand_embs, axis=2)
    return ls, we


if __name__ == "__main__":
    B, S, C, E, H = 2, 16, 4, 32, 100
    init_range = 0.02

    key = jax.random.PRNGKey(0)
    k_span, k_cand, k_prior, k_mask, k_w1, k_b1, k_w2, k_b2 = jax.random.split(key, 8)

    span_reps = jax.random.normal(k_span, (B, S, E), dtype=jnp.float32)
    cand_embs = jax.random.normal(k_cand, (B, S, C, E), dtype=jnp.float32)

    prior_logits = jax.random.normal(k_prior, (B, S, C), dtype=jnp.float32)
    prior = jax.nn.softmax(prior_logits, axis=-1)

    entity_mask = jax.random.uniform(k_mask, (B, S, C)) > 0.3
    entity_mask = entity_mask.at[..., 0].set(True)      # >=1 valid candidate

    w1 = init_range * jax.random.normal(k_w1, (H, 2), dtype=jnp.float32)
    b1 = init_range * jax.random.normal(k_b1, (H,), dtype=jnp.float32)
    w2 = init_range * jax.random.normal(k_w2, (1, H), dtype=jnp.float32)
    b2 = init_range * jax.random.normal(k_b2, (1,), dtype=jnp.float32)

    # ---- float32 activations --------------------------------------------------
    out = dot_attention_with_prior(span_reps, cand_embs, prior, entity_mask,
                                   w1, b1, w2, b2)
    jax.block_until_ready(out)

    ls_exp, we_exp = _reference(span_reps, cand_embs, prior, entity_mask,
                                w1, b1, w2, b2)
    assert jnp.allclose(out["linking_scores"], ls_exp, atol=1e-3, rtol=1e-3)
    assert jnp.allclose(out["weighted_entity_embeddings"], we_exp,
                        atol=2e-3, rtol=2e-3)

    # ---- bfloat16 activations (halves cand HBM traffic on v5e/v6e); the kernel
    #      upcasts internally, so compare against a reference fed the same
    #      bf16-rounded activations.
    span_bf = span_reps.astype(jnp.bfloat16)
    cand_bf = cand_embs.astype(jnp.bfloat16)
    out_bf = dot_attention_with_prior(span_bf, cand_bf, prior, entity_mask,
                                      w1, b1, w2, b2)
    jax.block_until_ready(out_bf)
    ls_exp2, we_exp2 = _reference(span_bf.astype(jnp.float32),
                                  cand_bf.astype(jnp.float32),
                                  prior, entity_mask, w1, b1, w2, b2)
    assert jnp.allclose(out_bf["linking_scores"], ls_exp2, atol=2e-3, rtol=2e-3)
    assert jnp.allclose(out_bf["weighted_entity_embeddings"], we_exp2,
                        atol=2e-3, rtol=2e-3)

    print("KERNEL_OK")
</pallas_src>

<mosaic_0001>
module attributes {stable_mosaic.version = 11 : i64} {
  func.func @_dot_attn_kernel(%arg0: i32, %arg1: memref<16x32xf32, #tpu.memory_space<vmem>>, %arg2: memref<16x128xf32, #tpu.memory_space<vmem>>, %arg3: memref<16x24xf32, #tpu.memory_space<vmem>>, %arg4: memref<32x128xf32, #tpu.memory_space<vmem>>, %arg5: memref<128x512xf32, #tpu.memory_space<vmem>>, %arg6: memref<24x512xf32, #tpu.memory_space<vmem>>, %arg7: memref<512x8xf32, #tpu.memory_space<vmem>>, %arg8: memref<8x128xf32, #tpu.memory_space<vmem>>, %arg9: memref<128x32xf32, #tpu.memory_space<vmem>>, %arg10: memref<16x8xf32, #tpu.memory_space<vmem>>, %arg11: memref<16x32xf32, #tpu.memory_space<vmem>>) attributes {dimension_semantics = [#tpu.dimension_semantics<parallel>], iteration_bounds = array<i64: 2>, scalar_prefetch = 0 : i64, scratch_operands = 0 : i64, tpu.core_type = #tpu.core_type<tc>, window_params = [{transform_indices = @transform_0, window_bounds = array<i64: 16, 32>}, {transform_indices = @transform_1, window_bounds = array<i64: 16, 128>}, {transform_indices = @transform_2, window_bounds = array<i64: 16, 24>}, {pipeline_mode = #tpu.pipeline_mode<synchronous>, transform_indices = @transform_3, window_bounds = array<i64: 32, 128>}, {pipeline_mode = #tpu.pipeline_mode<synchronous>, transform_indices = @transform_4, window_bounds = array<i64: 128, 512>}, {pipeline_mode = #tpu.pipeline_mode<synchronous>, transform_indices = @transform_5, window_bounds = array<i64: 24, 512>}, {pipeline_mode = #tpu.pipeline_mode<synchronous>, transform_indices = @transform_6, window_bounds = array<i64: 512, 8>}, {pipeline_mode = #tpu.pipeline_mode<synchronous>, transform_indices = @transform_7, window_bounds = array<i64: 8, 128>}, {pipeline_mode = #tpu.pipeline_mode<synchronous>, transform_indices = @transform_8, window_bounds = array<i64: 128, 32>}, {transform_indices = @transform_9, window_bounds = array<i64: 16, 8>}, {transform_indices = @transform_10, window_bounds = array<i64: 16, 32>}]} {
    %c0 = arith.constant 0 : index
    %c0_0 = arith.constant 0 : index
    %0 = vector.load %arg1[%c0, %c0_0] : memref<16x32xf32, #tpu.memory_space<vmem>>, vector<16x32xf32>
    %c0_1 = arith.constant 0 : index
    %c0_2 = arith.constant 0 : index
    %1 = vector.load %arg2[%c0_1, %c0_2] : memref<16x128xf32, #tpu.memory_space<vmem>>, vector<16x128xf32>
    %c0_3 = arith.constant 0 : index
    %c0_4 = arith.constant 0 : index
    %2 = vector.load %arg3[%c0_3, %c0_4] : memref<16x24xf32, #tpu.memory_space<vmem>>, vector<16x24xf32>
    %c0_5 = arith.constant 0 : index
    %c0_6 = arith.constant 0 : index
    %3 = vector.load %arg4[%c0_5, %c0_6] : memref<32x128xf32, #tpu.memory_space<vmem>>, vector<32x128xf32>
    %cst = arith.constant dense<0.000000e+00> : vector<16x128xf32>
    %4 = tpu.matmul %0, %3, %cst {dimension_numbers = #tpu.dot_dimension_numbers<[1], [0], [0], [1], [0, 0, 1, 1], [], []>} : vector<16x32xf32>, vector<32x128xf32>, vector<16x128xf32> -> vector<16x128xf32>
    %5 = arith.mulf %4, %1 : vector<16x128xf32>
    %c0_7 = arith.constant 0 : index
    %c0_8 = arith.constant 0 : index
    %6 = vector.load %arg5[%c0_7, %c0_8] : memref<128x512xf32, #tpu.memory_space<vmem>>, vector<128x512xf32>
    %cst_9 = arith.constant dense<0.000000e+00> : vector<16x512xf32>
    %7 = tpu.matmul %5, %6, %cst_9 {dimension_numbers = #tpu.dot_dimension_numbers<[1], [0], [0], [1], [0, 0, 1, 1], [], []>} : vector<16x128xf32>, vector<128x512xf32>, vector<16x512xf32> -> vector<16x512xf32>
    %c0_10 = arith.constant 0 : index
    %c0_11 = arith.constant 0 : index
    %8 = vector.load %arg6[%c0_10, %c0_11] : memref<24x512xf32, #tpu.memory_space<vmem>>, vector<24x512xf32>
    %cst_12 = arith.constant dense<0.000000e+00> : vector<16x512xf32>
    %9 = tpu.matmul %2, %8, %cst_12 {dimension_numbers = #tpu.dot_dimension_numbers<[1], [0], [0], [1], [0, 0, 1, 1], [], []>} : vector<16x24xf32>, vector<24x512xf32>, vector<16x512xf32> -> vector<16x512xf32>
    %10 = arith.addf %7, %9 : vector<16x512xf32>
    %cst_13 = arith.constant 0.000000e+00 : f32
    %11 = vector.broadcast %cst_13 : f32 to vector<16x512xf32>
    %12 = arith.maximumf %10, %11 : vector<16x512xf32>
    %c0_14 = arith.constant 0 : index
    %c0_15 = arith.constant 0 : index
    %13 = vector.load %arg7[%c0_14, %c0_15] : memref<512x8xf32, #tpu.memory_space<vmem>>, vector<512x8xf32>
    %cst_16 = arith.constant dense<0.000000e+00> : vector<16x8xf32>
    %14 = tpu.matmul %12, %13, %cst_16 {dimension_numbers = #tpu.dot_dimension_numbers<[1], [0], [0], [1], [0, 0, 1, 1], [], []>} : vector<16x512xf32>, vector<512x8xf32>, vector<16x8xf32> -> vector<16x8xf32>
    %15 = vector.extract_strided_slice %2 {offsets = [0, 0], sizes = [16, 8], strides = [1, 1]} : vector<16x24xf32> to vector<16x8xf32>
    %16 = tpu.iota {dimensions = array<i32: 1>} : vector<16x8xi32>
    %c4_i32 = arith.constant 4 : i32
    %17 = vector.broadcast %c4_i32 : i32 to vector<16x8xi32>
    %18 = arith.cmpi slt, %16, %17 : vector<16x8xi32>
    %cst_17 = arith.constant -1.000000e+04 : f32
    %cst_18 = arith.constant 0xFF800000 : f32
    %19 = vector.broadcast %cst_17 : f32 to vector<16x8xf32>
    %20 = vector.broadcast %cst_18 : f32 to vector<16x8xf32>
    %21 = arith.select %18, %19, %20 : vector<16x8xi1>, vector<16x8xf32>
    %cst_19 = arith.constant 5.000000e-01 : f32
    %22 = vector.broadcast %cst_19 : f32 to vector<16x8xf32>
    %23 = arith.cmpf ogt, %15, %22 : vector<16x8xf32>
    %24 = arith.select %23, %14, %21 : vector<16x8xi1>, vector<16x8xf32>
    %c0_20 = arith.constant 0 : index
    %c0_21 = arith.constant 0 : index
    %25 = vector.load %arg10[%c0_20, %c0_21] : memref<16x8xf32, #tpu.memory_space<vmem>>, vector<16x8xf32>
    tpu.vector_store %arg10[%c0_20, %c0_21], %24 {strides = array<i32>} : memref<16x8xf32, #tpu.memory_space<vmem>>, vector<16x8xf32>,
    %cst_22 = arith.constant dense<0xFF800000> : vector<16xf32>
    %26 = vector.multi_reduction <maximumf>, %24, %cst_22 [1] : vector<16x8xf32> to vector<16xf32>
    %27 = vector.shape_cast %26 : vector<16xf32> to vector<16x1xf32>
    %28 = vector.broadcast %27 : vector<16x1xf32> to vector<16x8xf32>
    %29 = arith.subf %24, %28 : vector<16x8xf32>
    %30 = math.exp %29 : vector<16x8xf32>
    %cst_23 = arith.constant dense<0.000000e+00> : vector<16xf32>
    %31 = vector.multi_reduction <add>, %30, %cst_23 [1] : vector<16x8xf32> to vector<16xf32>
    %32 = vector.shape_cast %31 : vector<16xf32> to vector<16x1xf32>
    %33 = tpu.reciprocal %32 {approx = true} : vector<16x1xf32> -> vector<16x1xf32>
    %34 = vector.broadcast %33 : vector<16x1xf32> to vector<16x8xf32>
    %35 = arith.mulf %30, %34 : vector<16x8xf32>
    %c0_24 = arith.constant 0 : index
    %c0_25 = arith.constant 0 : index
    %36 = vector.load %arg8[%c0_24, %c0_25] : memref<8x128xf32, #tpu.memory_space<vmem>>, vector<8x128xf32>
    %cst_26 = arith.constant dense<0.000000e+00> : vector<16x128xf32>
    %37 = tpu.matmul %35, %36, %cst_26 {dimension_numbers = #tpu.dot_dimension_numbers<[1], [0], [0], [1], [0, 0, 1, 1], [], []>} : vector<16x8xf32>, vector<8x128xf32>, vector<16x128xf32> -> vector<16x128xf32>
    %38 = arith.mulf %37, %1 : vector<16x128xf32>
    %c0_27 = arith.constant 0 : index
    %c0_28 = arith.constant 0 : index
    %39 = vector.load %arg9[%c0_27, %c0_28] : memref<128x32xf32, #tpu.memory_space<vmem>>, vector<128x32xf32>
    %cst_29 = arith.constant dense<0.000000e+00> : vector<16x32xf32>
    %40 = tpu.matmul %38, %39, %cst_29 {dimension_numbers = #tpu.dot_dimension_numbers<[1], [0], [0], [1], [0, 0, 1, 1], [], []>} : vector<16x128xf32>, vector<128x32xf32>, vector<16x32xf32> -> vector<16x32xf32>
    %c0_30 = arith.constant 0 : index
    %c0_31 = arith.constant 0 : index
    %41 = vector.load %arg11[%c0_30, %c0_31] : memref<16x32xf32, #tpu.memory_space<vmem>>, vector<16x32xf32>
    tpu.vector_store %arg11[%c0_30, %c0_31], %40 {strides = array<i32>} : memref<16x32xf32, #tpu.memory_space<vmem>>, vector<16x32xf32>,
    return
  }
  func.func @transform_0(%arg0: i32) -> (i32, i32) {
    %c0_i32 = arith.constant 0 : i32
    %c0_i32_0 = arith.constant 0 : i32
    return %arg0, %c0_i32 : i32, i32
  }
  func.func @transform_1(%arg0: i32) -> (i32, i32) {
    %c0_i32 = arith.constant 0 : i32
    %c0_i32_0 = arith.constant 0 : i32
    return %arg0, %c0_i32 : i32, i32
  }
  func.func @transform_2(%arg0: i32) -> (i32, i32) {
    %c0_i32 = arith.constant 0 : i32
    %c0_i32_0 = arith.constant 0 : i32
    return %arg0, %c0_i32 : i32, i32
  }
  func.func @transform_3(%arg0: i32) -> (i32, i32) {
    %c0_i32 = arith.constant 0 : i32
    %c0_i32_0 = arith.constant 0 : i32
    %c0_i32_1 = arith.constant 0 : i32
    return %c0_i32, %c0_i32_0 : i32, i32
  }
  func.func @transform_4(%arg0: i32) -> (i32, i32) {
    %c0_i32 = arith.constant 0 : i32
    %c0_i32_0 = arith.constant 0 : i32
    %c0_i32_1 = arith.constant 0 : i32
    return %c0_i32, %c0_i32_0 : i32, i32
  }
  func.func @transform_5(%arg0: i32) -> (i32, i32) {
    %c0_i32 = arith.constant 0 : i32
    %c0_i32_0 = arith.constant 0 : i32
    %c0_i32_1 = arith.constant 0 : i32
    return %c0_i32, %c0_i32_0 : i32, i32
  }
  func.func @transform_6(%arg0: i32) -> (i32, i32) {
    %c0_i32 = arith.constant 0 : i32
    %c0_i32_0 = arith.constant 0 : i32
    %c0_i32_1 = arith.constant 0 : i32
    return %c0_i32, %c0_i32_0 : i32, i32
  }
  func.func @transform_7(%arg0: i32) -> (i32, i32) {
    %c0_i32 = arith.constant 0 : i32
    %c0_i32_0 = arith.constant 0 : i32
    %c0_i32_1 = arith.constant 0 : i32
    return %c0_i32, %c0_i32_0 : i32, i32
  }
  func.func @transform_8(%arg0: i32) -> (i32, i32) {
    %c0_i32 = arith.constant 0 : i32
    %c0_i32_0 = arith.constant 0 : i32
    %c0_i32_1 = arith.constant 0 : i32
    return %c0_i32, %c0_i32_0 : i32, i32
  }
  func.func @transform_9(%arg0: i32) -> (i32, i32) {
    %c0_i32 = arith.constant 0 : i32
    %c0_i32_0 = arith.constant 0 : i32
    return %arg0, %c0_i32 : i32, i32
  }
  func.func @transform_10(%arg0: i32) -> (i32, i32) {
    %c0_i32 = arith.constant 0 : i32
    %c0_i32_0 = arith.constant 0 : i32
    return %arg0, %c0_i32 : i32, i32
  }
}

</mosaic_0001>

<bundles_post_ra>
// kernel: tpu_custom_call.1
= control target key start
LH: loop header
LB: loop body
LE: loop exit
PB: predicated region body
PF: predicated region fallthrough
CT: control target
= control target key end

     0   :  { %s2662_s0 = inlined_call_operand.vmem [shape: f32[32,32], index: 0, kind: input, shape index: {}]   ;;  %s2663_s1 = inlined_call_operand.vmem [shape: f32[32,128], index: 1, kind: input, shape index: {}]   ;;  %s2664_s2 = inlined_call_operand.vmem [shape: f32[32,24], index: 2, kind: input, shape index: {}]   ;;  %s2665_s3 = inlined_call_operand.vmem [shape: f32[32,128], index: 3, kind: input, shape index: {}]   ;;  %s2666_s4 = inlined_call_operand.vmem [shape: f32[128,512], index: 4, kind: input, shape index: {}]   ;;  %s2667_s5 = inlined_call_operand.vmem [shape: f32[24,512], index: 5, kind: input, shape index: {}]   ;;  %s2668_s6 = inlined_call_operand.vmem [shape: f32[512,8], index: 6, kind: input, shape index: {}]   ;;  %s2669_s7 = inlined_call_operand.vmem [shape: f32[8,128], index: 7, kind: input, shape index: {}]   ;;  %s2670_s8 = inlined_call_operand.vmem [shape: f32[128,32], index: 8, kind: input, shape index: {}]   ;;  %s2671_s9 = inlined_call_operand.vmem [shape: f32[32,8], index: 9, kind: output, shape index: {0}]   ;;  %s2672_s10 = inlined_call_operand.hbm [shape: f32[32,32], index: 10, kind: output, shape index: {1}]  }
   0x1   :  { %2673 = sst [smem:[#allocation5_spill]] %s2662_s0 }
   0x2   :  { %2674 = sst [smem:[#allocation6_spill]] %s2665_s3 }
   0x3   :  { %16 = vsyncpa [#allocation3], 0 }
   0x4   :  { %18 = vsyncpa [#allocation3 + $0x1], 0  ;;  %s2010_s13 = smov 0   ;;  %s2012_s14 = smov 0  }
   0x5   :  { %s2014_s15 = smov 0   ;;  %s2016_s16 = smov 0  }
   0x6 LB: > { %s2031_s17 = sadd.s32 4294967295, %s1948_s16   ;;  %s1470_s18 = sadd.s32 4294967294, %s1948_s16   ;;  %s1948_s16 = sphi %s2016_s16, %s2682_s16   ;;  %s1944_s15 = sphi %s2014_s15, %s2681_s15   ;;  %s1940_s14 = sphi %s2012_s14, %s2680_s14   ;;  %s1936_s13 = sphi %s2010_s13, %s2679_s13  }
   0x7   : > { %s2035_s19 = sadd.s32 1, %s1948_s16   ;;  %s261_s20 = sadd.s32 1, %s1944_s15 }
   0x8   : > { %s258_s21 = ssub.s32 %s1948_s16, %s2035_s19  ;;  %p271_p0 = scmp.ne.s32.totalorder %s1944_s15, %s1940_s14 }
   0x9   : > { %p259_p1 = scmp.eq.s32.totalorder %s258_s21, 0  ;;  %p272_p2 = scmp.eq.s32.totalorder %s2031_s17, 1 }
   0xa   : > { %p277_p3 = scmp.ne.s32.totalorder %s1940_s14, %s1936_s13  ;;  %p278_p4 = scmp.eq.s32.totalorder %s1470_s18, 1 }
   0xb   : > { %s2046_s22 = scalar_select %p259_p1, %s1944_s15, %s261_s20  }
   0xc   : > { %p2048_p5 = por %p272_p2, %p271_p0  ;;  %p2052_p6 = por %p278_p4, %p277_p3 }
   0xd   : > { %p1473_p7 = scmp.ge.s32.totalorder %s1948_s16, 1  ;;  %p341_p8 = scmp.lt.s32.totalorder %s1948_s16, 3 }
   0xf   : > { %p342_p9 = pnand %p1473_p7, %p341_p8 }
  0x10   : > { %s2677_s3 = sld [smem:[#allocation6_spill]] (!%p342_p9)  ;;  %s1475_s11 = sshll.u32 (!%p342_p9), %s2031_s17, 1  ;;  %v1950_v5 = vmov (!%p342_p9), 0.0   ;;  %v578_v7 = vld [vmem:[%s2667_s5 + $0x8] sm:$0xff] (!%p342_p9)  ;;  %vm429_vm0 = vcmask (!%p342_p9), 261120   ;;  %v577_v10 = vld [vmem:[%s2667_s5] sm:$0xff] (!%p342_p9) }
  0x11   : > { %345 = sbr.rel (%p342_p9) target bundleno = 1446 (0x5a6), region = 56  ;;  %p395_p10 = scmp.lt.s32.totalorder (!%p342_p9), %s1475_s11, 3  ;;  %891 = vmatprep.mubr.f32.mxu0 (!%p342_p9), %v1950_v5  ;;  %v582_v8 = vld [vmem:[%s2667_s5 + $0x28] sm:$0xff] (!%p342_p9)  ;;  %v581_v11 = vld [vmem:[%s2667_s5 + $0x20] sm:$0xff] (!%p342_p9)  ;;  %v516_v12 = vld [vmem:[%s2666_s4 + $0x18] sm:$0xff] (!%p342_p9)  ;;  %vm589_vm1 = vcmask (!%p342_p9), 195584  }
  0x12   : > { %v1659_v9 = vpack.c.bf16 (!%p342_p9), %v582_v8, %v578_v7  ;;  %s2678_s0 = sld [smem:[#allocation5_spill]] (!%p342_p9)  ;;  %v520_v13 = vld [vmem:[%s2666_s4 + $0x38] sm:$0xff] (!%p342_p9)  ;;  %v1661_v17 = vpack.c.bf16 (!%p342_p9), %v581_v11, %v577_v10  ;;  %v515_v18 = vld [vmem:[%s2666_s4 + $0x10] sm:$0xff] (!%p342_p9)  ;;  %v586_v19 = vld [vmem:[%s2667_s5 + $0x48] sm:$0xff] (!%p342_p9)  ;;  %vm1134_vm4 = vcmask (!%p342_p9), 64512  }
  0x13   : > { %v1699_v15 = vpack.c.bf16 (!%p342_p9), %v520_v13, %v516_v12  ;;  %v580_v20 = vld [vmem:[%s2667_s5 + $0x18] sm:$0xff] (!%p342_p9)  ;;  %v519_v21 = vld [vmem:[%s2666_s4 + $0x30] sm:$0xff] (!%p342_p9)  ;;  %v585_v31 = vld [vmem:[%s2667_s5 + $0x40] sm:$0xff] (!%p342_p9) }
  0x14   : > { %v584_v22 = vld [vmem:[%s2667_s5 + $0x38] sm:$0xff] (!%p342_p9)  ;;  %v1701_v23 = vpack.c.bf16 (!%p342_p9), %v519_v21, %v515_v18  ;;  %v579_v26 = vld [vmem:[%s2667_s5 + $0x10] sm:$0xff] (!%p342_p9)  ;;  %v514_v38 = vld [vmem:[%s2666_s4 + $0x8] sm:$0xff] (!%p342_p9) }
  0x15   : > { %1700 = vmatprep.subr.bf16.mxu0 (!%p342_p9), %v1699_v15  ;;  %v524_v24 = vld [vmem:[%s2666_s4 + $0x58] sm:$0xff] (!%p342_p9)  ;;  %v583_v27 = vld [vmem:[%s2667_s5 + $0x30] sm:$0xff] (!%p342_p9)  ;;  %v1663_v32 = vpack.c.bf16 (!%p342_p9), %v584_v22, %v580_v20  ;;  %v518_v40 = vld [vmem:[%s2666_s4 + $0x28] sm:$0xff] (!%p342_p9) }
  0x16   : > { %v425_v0 = vld [vmem:[%s2677_s3] sm:$0xff] (!%p342_p9)  ;;  %v426_v1 = vld [vmem:[%s2677_s3 + $0x8] sm:$0xff] (!%p342_p9)  ;;  %v427_v2 = vld [vmem:[%s2677_s3 + $0x10] sm:$0xff] (!%p342_p9)  ;;  %1702 = vmatpush1.bf16.msra.mxu0 (!%p342_p9), %v1701_v23  ;;  %v1665_v36 = vpack.c.bf16 (!%p342_p9), %v583_v27, %v579_v26  ;;  %v1667_v48 = vpack.c.bf16 (!%p342_p9), %v518_v40, %v514_v38 }
  0x17   : > { %v1651_v3 = vpack.c.bf16 (!%p342_p9), %v426_v1, %v425_v0  ;;  %v428_v4 = vld [vmem:[%s2677_s3 + $0x18] sm:$0xff] (!%p342_p9)  ;;  %v523_v29 = vld [vmem:[%s2666_s4 + $0x50] sm:$0xff] (!%p342_p9)  ;;  %v513_v49 = vld [vmem:[%s2666_s4] sm:$0xff] (!%p342_p9) }
  0x18   : > { %v1655_v6 = vpack.c.bf16 %v428_v4, %v427_v2  ;;  %s2684_s11 = smov (!%p395_p10, %s1475_s11), 3  ;;  %v528_v25 = vld [vmem:[%s2666_s4 + $0x78] sm:$0xff]  ;;  %v527_v30 = vld [vmem:[%s2666_s4 + $0x70] sm:$0xff]  ;;  %v517_v50 = vld [vmem:[%s2666_s4 + $0x20] sm:$0xff] }
  0x19   : > { %1652 = vmatprep.subr.bf16.mxu1 %v1651_v3  ;;  %s2078_s27 = sshll.u32 %s2684_s11, 3  ;;  %v1703_v28 = vpack.c.bf16 %v528_v25, %v524_v24  ;;  %v532_v33 = vld [vmem:[%s2666_s4 + $0x98] sm:$0xff]  ;;  %v1705_v39 = vpack.c.bf16 %v527_v30, %v523_v29  ;;  %v531_v42 = vld [vmem:[%s2666_s4 + $0x90] sm:$0xff]  ;;  %v522_v51 = vld [vmem:[%s2666_s4 + $0x48] sm:$0xff]  ;;  %v1669_v59 = vpack.c.bf16 %v517_v50, %v513_v49 }
  0x1a   : > { %1654 = vmatpush3.bf16.msra.mxu1 %v1651_v3  ;;  %s398_s21 = scalar_lea.vmem %s2678_s0, %s2078_s27  ;;  %s2123_s3 = scalar_lea.vmem %s2664_s2, %s2078_s27  ;;  %v536_v34 = vld [vmem:[%s2666_s4 + $0xb8] sm:$0xff]  ;;  %v535_v43 = vld [vmem:[%s2666_s4 + $0xb0] sm:$0xff]  ;;  %v526_v53 = vld [vmem:[%s2666_s4 + $0x68] sm:$0xff] }
  0x1b   : > { %1656 = vmatprep.subr.bf16.mxu1 %v1655_v6  ;;  %v419_v14 = vld [vmem:[%s398_s21] sm:$0xff]  ;;  %v420_v16 = vld [vmem:[%s398_s21 + $0x8] sm:$0xff]  ;;  %1704 = vmatprep.subr.bf16.mxu0 %v1703_v28  ;;  %v588_v37 = vld [vmem:[%s2667_s5 + $0x58] sm:$0xff]  ;;  %v1707_v41 = vpack.c.bf16 %v536_v34, %v532_v33  ;;  %v1709_v52 = vpack.c.bf16 %v535_v43, %v531_v42  ;;  %v1671_v60 = vpack.c.bf16 %v526_v53, %v522_v51  ;;  %s404_s29 = scalar_lea.vmem %s2663_s1, %s2078_s27  ;;  %s416_s20 = scalar_lea.vmem %s2671_s9, %s2078_s27 }
  0x1c   : > { %1608 = vmatprep.mubr.msk.f32.mxu1 %vm429_vm0, %v419_v14  ;;  %v2148_v35 = vld [vmem:[%s2123_s3] sm:$0xff]  ;;  %v540_v44 = vld [vmem:[%s2666_s4 + $0xd8] sm:$0xff]  ;;  %v2175_v46 = vld [vmem:[%s2123_s3 + $0x8] sm:$0xff]  ;;  %1706 = vmatpush1.bf16.msra.mxu0 %v1705_v39 }
  0x1d   : > { %v544_v45 = vld [vmem:[%s2666_s4 + $0xf8] sm:$0xff]  ;;  %v587_v47 = vld [vmem:[%s2667_s5 + $0x50] sm:$0xff]  ;;  %1708 = vmatprep.subr.bf16.mxu0 %v1707_v41  ;;  %v521_v61 = vld [vmem:[%s2666_s4 + $0x40] sm:$0xff]  ;;  %vm1130_vm3 = vcmp.gt.f32.partialorder %v2148_v35, 0.5  ;;  %vm1131_vm5 = vcmp.gt.f32.partialorder %v2175_v46, 0.5 }
  0x1e   : > { %1658 = vmatpush3.bf16.msra.mxu1 %v1655_v6  ;;  %v1711_v54 = vpack.c.bf16 %v544_v45, %v540_v44  ;;  %v539_v55 = vld [vmem:[%s2666_s4 + $0xd0] sm:$0xff]  ;;  %v548_v57 = vld [vmem:[%s2666_s4 + $0x118] sm:$0xff]  ;;  %v525_v62 = vld [vmem:[%s2666_s4 + $0x60] sm:$0xff] }
  0x1f   : > { %1660 = vmatprep.subr.bf16.mxu1 %v1659_v9  ;;  %v543_v56 = vld [vmem:[%s2666_s4 + $0xf0] sm:$0xff]  ;;  %v552_v58 = vld [vmem:[%s2666_s4 + $0x138] sm:$0xff]  ;;  %v530_v63 = vld [vmem:[%s2666_s4 + $0x88] sm:$0xff]  ;;  %v1673_v8 = vpack.c.bf16 %v525_v62, %v521_v61 }
  0x20   : > { %1710 = vmatpush1.bf16.msra.mxu0 %v1709_v52  ;;  %v1713_v0 = vpack.c.bf16 %v543_v56, %v539_v55  ;;  %v534_v1 = vld [vmem:[%s2666_s4 + $0xa8] sm:$0xff]  ;;  %v1715_v2 = vpack.c.bf16 %v552_v58, %v548_v57  ;;  %v547_v3 = vld [vmem:[%s2666_s4 + $0x110] sm:$0xff]  ;;  %v556_v6 = vld [vmem:[%s2666_s4 + $0x158] sm:$0xff] }
  0x21   : > { %1609 = vmatmul.mubr.msk.f32.vlgmr.msra.gmra.mrb[0].mxu1 %vm429_vm0, %v420_v16  ;;  %1712 = vmatprep.subr.bf16.mxu0 %v1711_v54  ;;  %v551_v4 = vld [vmem:[%s2666_s4 + $0x130] sm:$0xff]  ;;  %v560_v7 = vld [vmem:[%s2666_s4 + $0x178] sm:$0xff]  ;;  %v1675_v9 = vpack.c.bf16 %v534_v1, %v530_v63  ;;  %v529_v10 = vld [vmem:[%s2666_s4 + $0x80] sm:$0xff] }
  0x22   : > { %1662 = vmatpush1.bf16.msra.mxu1 %v1661_v17  ;;  %660 = vmatprep.mubr.f32.mxu1 %v1950_v5  ;;  %v533_v11 = vld [vmem:[%s2666_s4 + $0xa0] sm:$0xff]  ;;  %v538_v12 = vld [vmem:[%s2666_s4 + $0xc8] sm:$0xff]  ;;  %v1717_v13 = vpack.c.bf16 %v551_v4, %v547_v3  ;;  %v1719_v15 = vpack.c.bf16 %v560_v7, %v556_v6  ;;  %v555_v16 = vld [vmem:[%s2666_s4 + $0x150] sm:$0xff] }
  0x23   : > { %600 = vmatprep.subr.mxu1 %v586_v19  ;;  %v542_v14 = vld [vmem:[%s2666_s4 + $0xe8] sm:$0xff]  ;;  %v559_v17 = vld [vmem:[%s2666_s4 + $0x170] sm:$0xff]  ;;  %v564_v18 = vld [vmem:[%s2666_s4 + $0x198] sm:$0xff]  ;;  %v1677_v20 = vpack.c.bf16 %v533_v11, %v529_v10 }
  0x24   : > { %1714 = vmatpush1.bf16.msra.mxu0 %v1713_v0  ;;  %v568_v19 = vld [vmem:[%s2666_s4 + $0x1b8] sm:$0xff]  ;;  %v1679_v21 = vpack.c.bf16 %v542_v14, %v538_v12  ;;  %v537_v22 = vld [vmem:[%s2666_s4 + $0xc0] sm:$0xff]  ;;  %v546_v24 = vld [vmem:[%s2666_s4 + $0x108] sm:$0xff]  ;;  %v1721_v25 = vpack.c.bf16 %v559_v17, %v555_v16 }
  0x25   : > { %1716 = vmatprep.subr.bf16.mxu0 %v1715_v2  ;;  %v541_v23 = vld [vmem:[%s2666_s4 + $0xe0] sm:$0xff]  ;;  %v550_v26 = vld [vmem:[%s2666_s4 + $0x128] sm:$0xff]  ;;  %v1723_v27 = vpack.c.bf16 %v568_v19, %v564_v18  ;;  %v563_v28 = vld [vmem:[%s2666_s4 + $0x190] sm:$0xff] }
  0x26   : > { %601 = vmatpush1.msra.mxu1 %v585_v31  ;;  %v567_v29 = vld [vmem:[%s2666_s4 + $0x1b0] sm:$0xff]  ;;  %v1681_v30 = vpack.c.bf16 %v541_v23, %v537_v22  ;;  %v1683_v31 = vpack.c.bf16 %v550_v26, %v546_v24  ;;  %v549_v33 = vld [vmem:[%s2666_s4 + $0x120] sm:$0xff]  ;;  %v562_v42 = vld [vmem:[%s2666_s4 + $0x188] sm:$0xff] }
  0x27   : > { %1485 = vmatmul.mubr.msk.f32.vlgmr.msra.gmra.mrb[2].mxu1 %vm589_vm1, %v2148_v35  ;;  %1664 = vmatprep.subr.bf16.mxu1 %v1663_v32  ;;  %v545_v32 = vld [vmem:[%s2666_s4 + $0x100] sm:$0xff]  ;;  %v1725_v34 = vpack.c.bf16 %v567_v29, %v563_v28  ;;  %v566_v43 = vld [vmem:[%s2666_s4 + $0x1a8] sm:$0xff]  ;;  %v572_v52 = vld [vmem:[%s2666_s4 + $0x1d8] sm:$0xff] }
  0x28   : > { %1666 = vmatpush1.bf16.msra.mxu1 %v1665_v36  ;;  %666 = vmatprep.mubr.f32.mxu1 %v1950_v5  ;;  %v554_v36 = vld [vmem:[%s2666_s4 + $0x148] sm:$0xff]  ;;  %v1685_v38 = vpack.c.bf16 %v549_v33, %v545_v32  ;;  %v553_v40 = vld [vmem:[%s2666_s4 + $0x140] sm:$0xff]  ;;  %v1691_v45 = vpack.c.bf16 %v566_v43, %v562_v42  ;;  %v576_v54 = vld [vmem:[%s2666_s4 + $0x1f8] sm:$0xff] }
  0x29   : > { %677 = vmatprep.subr.mxu1 %v588_v37  ;;  %1718 = vmatpush1.bf16.msra.mxu0 %v1717_v13  ;;  %v558_v37 = vld [vmem:[%s2666_s4 + $0x168] sm:$0xff]  ;;  %v557_v41 = vld [vmem:[%s2666_s4 + $0x160] sm:$0xff]  ;;  %v1727_v57 = vpack.c.bf16 %v576_v54, %v572_v52  ;;  %v930_v10 = vld [vmem:[%s2668_s6 + $0x90] sm:$0xff] }
  0x2a   : > { %1720 = vmatprep.subr.bf16.mxu0 %v1719_v15  ;;  %v1687_v39 = vpack.c.bf16 %v558_v37, %v554_v36  ;;  %v1689_v44 = vpack.c.bf16 %v557_v41, %v553_v40  ;;  %v570_v50 = vld [vmem:[%s2666_s4 + $0x1c8] sm:$0xff]  ;;  %v569_v55 = vld [vmem:[%s2666_s4 + $0x1c0] sm:$0xff]  ;;  %v931_v12 = vld [vmem:[%s2668_s6 + $0x98] sm:$0xff] }
  0x2b   : > { %1486 = vmatmul.mubr.msk.f32.gmra.mrb[4].mxu1 %vm589_vm1, %v2175_v46  ;;  %v574_v51 = vld [vmem:[%s2666_s4 + $0x1e8] sm:$0xff]  ;;  %v573_v56 = vld [vmem:[%s2666_s4 + $0x1e0] sm:$0xff]  ;;  %v962_v13 = vld [vmem:[%s2668_s6 + $0x190] sm:$0xff]  ;;  %v1735_v22 = vpack.c.bf16 %v931_v12, %v930_v10 }
  0x2c   : > { %678 = vmatpush1.msra.mxu1 %v587_v47  ;;  %737 = vmatprep.mubr.f32.mxu1 %v1950_v5  ;;  %v561_v47 = vld [vmem:[%s2666_s4 + $0x180] sm:$0xff]  ;;  %v1695_v53 = vpack.c.bf16 %v574_v51, %v570_v50  ;;  %v1697_v58 = vpack.c.bf16 %v573_v56, %v569_v55  ;;  %v929_v63 = vld [vmem:[%s2668_s6 + $0x88] sm:$0xff]  ;;  %v963_v14 = vld [vmem:[%s2668_s6 + $0x198] sm:$0xff] }
  0x2d   : > { %1668 = vmatprep.subr.bf16.mxu1 %v1667_v48  ;;  %1722 = vmatpush1.bf16.msra.mxu0 %v1721_v25  ;;  %v565_v48 = vld [vmem:[%s2666_s4 + $0x1a0] sm:$0xff]  ;;  %v961_v2 = vld [vmem:[%s2668_s6 + $0x188] sm:$0xff]  ;;  %v1767_v23 = vpack.c.bf16 %v963_v14, %v962_v13  ;;  %v946_v24 = vld [vmem:[%s2668_s6 + $0x110] sm:$0xff] }
  0x2e   : > { %1724 = vmatprep.subr.bf16.mxu0 %v1723_v27  ;;  %v1693_v49 = vpack.c.bf16 %v565_v48, %v561_v47  ;;  %v928_v62 = vld [vmem:[%s2668_s6 + $0x80] sm:$0xff]  ;;  %v913_v7 = vld [vmem:[%s2668_s6 + $0x8] sm:$0xff]  ;;  %v947_v25 = vld [vmem:[%s2668_s6 + $0x118] sm:$0xff] }
  0x2f   : > { %1487 = vmatmul.mubr.msk.f32.vlgmr.msra.gmra.mrb[6].mxu1 %vm589_vm1, %v2148_v35  ;;  %v1731_v0 = vpack.c.bf16 %v929_v63, %v928_v62  ;;  %v960_v1 = vld [vmem:[%s2668_s6 + $0x180] sm:$0xff]  ;;  %v2375_v16 = vld [vmem:[%s404_s29 + $0x8] sm:$0xff]  ;;  %v1769_v32 = vpack.c.bf16 %v947_v25, %v946_v24  ;;  %v935_v40 = vld [vmem:[%s2668_s6 + $0xb8] sm:$0xff] }
  0x30   : > { %1670 = vmatpush1.bf16.msra.mxu1 %v1669_v59  ;;  %743 = vmatprep.mubr.f32.mxu1 %v1950_v5  ;;  %v571_v59 = vld [vmem:[%s2666_s4 + $0x1d0] sm:$0xff]  ;;  %v1763_v3 = vpack.c.bf16 %v961_v2, %v960_v1  ;;  %v2349_v4 = vld [vmem:[%s404_s29] sm:$0xff]  ;;  %v933_v27 = vld [vmem:[%s2668_s6 + $0xa8] sm:$0xff]  ;;  %s391_s29 = sand.u32 1, %s1940_s14  }
  0x31   : > { %1672 = vmatprep.subr.bf16.mxu1 %v1671_v60  ;;  %1726 = vmatpush1.bf16.msra.mxu0 %v1725_v34  ;;  %v575_v60 = vld [vmem:[%s2666_s4 + $0x1f0] sm:$0xff]  ;;  %v912_v6 = vld [vmem:[%s2668_s6] sm:$0xff]  ;;  %v965_v29 = vld [vmem:[%s2668_s6 + $0x1a8] sm:$0xff]  ;;  %s1474_s30 = sshll.u32 %s391_s29, 4  ;;  %s2621_s26 = scalar_lea.sflag [#allocation3], %s391_s29 }
  0x32   : > { %v1729_v61 = vpack.c.bf16 %v575_v60, %v571_v59  ;;  %1728 = vmatprep.subr.bf16.mxu0 %v1727_v57  ;;  %v1733_v18 = vpack.c.bf16 %v913_v7, %v912_v6  ;;  %v932_v26 = vld [vmem:[%s2668_s6 + $0xa0] sm:$0xff]  ;;  %v917_v34 = vld [vmem:[%s2668_s6 + $0x28] sm:$0xff]  ;;  %v966_v41 = vld [vmem:[%s2668_s6 + $0x1b0] sm:$0xff]  ;;  %s393_s12 = scalar_lea.vmem [#allocation2], %s1474_s30 }
  0x33   : > { %1488 = vmatmul.mubr.msk.f32.gmra.mrb[8].mxu1 %vm589_vm1, %v2175_v46  ;;  %v964_v28 = vld [vmem:[%s2668_s6 + $0x1a0] sm:$0xff]  ;;  %v1739_v36 = vpack.c.bf16 %v933_v27, %v932_v26  ;;  %v967_v42 = vld [vmem:[%s2668_s6 + $0x1b8] sm:$0xff]  ;;  %v950_v50 = vld [vmem:[%s2668_s6 + $0x130] sm:$0xff]  ;;  %s1359_s18 = sshll.u32 %s393_s12, 4  ;;  %s2612_s18 = int_to_ptr.vmem [resolvable:$true] %s1359_s18 }
  0x34   : > { %1674 = vmatpush1.bf16.msra.mxu1 %v1673_v8  ;;  %814 = vmatprep.mubr.f32.mxu1 %v1950_v5  ;;  %v944_v8 = vld [vmem:[%s2668_s6 + $0x100] sm:$0xff]  ;;  %v1771_v37 = vpack.c.bf16 %v965_v29, %v964_v28  ;;  %v919_v47 = vld [vmem:[%s2668_s6 + $0x38] sm:$0xff]  ;;  %v969_v55 = vld [vmem:[%s2668_s6 + $0x1c8] sm:$0xff]  ;;  %s1886_s0 = scalar_lea.vmem %s2612_s18, 256 }
  0x35   : > { %1676 = vmatprep.subr.bf16.mxu1 %v1675_v9  ;;  %1730 = vmatpush1.bf16.msra.mxu0 %v1729_v61  ;;  %v945_v9 = vld [vmem:[%s2668_s6 + $0x108] sm:$0xff]  ;;  %v916_v33 = vld [vmem:[%s2668_s6 + $0x20] sm:$0xff]  ;;  %v951_v51 = vld [vmem:[%s2668_s6 + $0x138] sm:$0xff]  ;;  %p1887_p11 = scmp.ne.s32.totalorder %s2612_s18, %s1886_s0 }
  0x36   : > { %1764 = vmatprep.subr.bf16.mxu0 %v1763_v3  ;;  %v1765_v19 = vpack.c.bf16 %v945_v9, %v944_v8  ;;  %v1741_v43 = vpack.c.bf16 %v917_v34, %v916_v33  ;;  %v936_v52 = vld [vmem:[%s2668_s6 + $0xc0] sm:$0xff]  ;;  %v921_v60 = vld [vmem:[%s2668_s6 + $0x48] sm:$0xff]  ;;  %v938_v2 = vld [vmem:[%s2668_s6 + $0xd0] sm:$0xff] }
  0x37   : > { %v968_v54 = vld [vmem:[%s2668_s6 + $0x1c0] sm:$0xff]  ;;  %v953_v1 = vld [vmem:[%s2668_s6 + $0x148] sm:$0xff]  ;;  %v939_v3 = vld [vmem:[%s2668_s6 + $0xd8] sm:$0xff]  ;;  %p1888_p12 = pnand %p1887_p11, %p2048_p5 }
  0x38   : > { %1678 = vmatpush1.bf16.msra.mxu1 %v1677_v20  ;;  %v914_v20 = vld [vmem:[%s2668_s6 + $0x10] sm:$0xff]  ;;  %v920_v59 = vld [vmem:[%s2668_s6 + $0x40] sm:$0xff]  ;;  %v1779_v63 = vpack.c.bf16 %v969_v55, %v968_v54  ;;  %v971_v7 = vld [vmem:[%s2668_s6 + $0x1d8] sm:$0xff]  ;;  %v1751_v13 = vpack.c.bf16 %v939_v3, %v938_v2 }
  0x39   : > { %1680 = vmatprep.subr.bf16.mxu1 %v1679_v21  ;;  %v915_v21 = vld [vmem:[%s2668_s6 + $0x18] sm:$0xff]  ;;  %v970_v6 = vld [vmem:[%s2668_s6 + $0x1d0] sm:$0xff]  ;;  %v1749_v8 = vpack.c.bf16 %v921_v60, %v920_v59  ;;  %v924_v26 = vld [vmem:[%s2668_s6 + $0x60] sm:$0xff]  ;;  %p1889_p13 = pneg %p1888_p12 }
  0x3a   : > { %v922_v10 = vld [vmem:[%s2668_s6 + $0x50] sm:$0xff]  ;;  %v1783_v14 = vpack.c.bf16 %v971_v7, %v970_v6  ;;  %v925_v27 = vld [vmem:[%s2668_s6 + $0x68] sm:$0xff]  ;;  %v943_v34 = vld [vmem:[%s2668_s6 + $0xf8] sm:$0xff] }
  0x3b   : > { %v1757_v29 = vpack.c.bf16 %v925_v27, %v924_v26  ;;  %v942_v33 = vld [vmem:[%s2668_s6 + $0xf0] sm:$0xff] }
  0x3c   : > { %1682 = vmatpush1.bf16.msra.mxu1 %v1681_v30 }
  0x3d   : > { %1684 = vmatprep.subr.bf16.mxu1 %v1683_v31  ;;  %v1737_v31 = vpack.c.bf16 %v915_v21, %v914_v20  ;;  %v941_v20 = vld [vmem:[%s2668_s6 + $0xe8] sm:$0xff]  ;;  %v972_v21 = vld [vmem:[%s2668_s6 + $0x1e0] sm:$0xff] }
  0x40   : > { %1686 = vmatpush1.bf16.msra.mxu1 %v1685_v38  ;;  %v949_v38 = vld [vmem:[%s2668_s6 + $0x128] sm:$0xff] }
  0x41   : > { %1688 = vmatprep.subr.bf16.mxu1 %v1687_v39  ;;  %v934_v39 = vld [vmem:[%s2668_s6 + $0xb0] sm:$0xff] }
  0x42   : > { %v1743_v48 = vpack.c.bf16 %v935_v40, %v934_v39  ;;  %v974_v39 = vld [vmem:[%s2668_s6 + $0x1f0] sm:$0xff]  ;;  %v975_v40 = vld [vmem:[%s2668_s6 + $0x1f8] sm:$0xff] }
  0x44   : > { %1690 = vmatpush1.bf16.msra.mxu1 %v1689_v44 }
  0x45   : > { %1692 = vmatprep.subr.bf16.mxu1 %v1691_v45  ;;  %v918_v45 = vld [vmem:[%s2668_s6 + $0x30] sm:$0xff] }
  0x46   : > { %v1745_v57 = vpack.c.bf16 %v919_v47, %v918_v45 }
  0x48   : > { %1694 = vmatpush1.bf16.msra.mxu1 %v1693_v49  ;;  %v1775_v49 = vpack.c.bf16 %v967_v42, %v966_v41  ;;  %v1791_v41 = vpack.c.bf16 %v975_v40, %v974_v39  ;;  %v958_v42 = vld [vmem:[%s2668_s6 + $0x170] sm:$0xff]  ;;  %v1246_v40 = vld [vmem:[%s2670_s8 + $0x18] sm:$0xff] }
  0x49   : > { %1696 = vmatprep.subr.bf16.mxu1 %v1695_v53  ;;  %v937_v53 = vld [vmem:[%s2668_s6 + $0xc8] sm:$0xff] }
  0x4a   : > { %v1747_v62 = vpack.c.bf16 %v937_v53, %v936_v52 }
  0x4c   : > { %1698 = vmatpush1.bf16.msra.mxu1 %v1697_v58  ;;  %v1777_v58 = vpack.c.bf16 %v951_v51, %v950_v50 }
  0x4d   : > { %1732 = vmatprep.subr.bf16.mxu1 %v1731_v0  ;;  %v952_v0 = vld [vmem:[%s2668_s6 + $0x140] sm:$0xff] }
  0x4e   : > { %v1781_v9 = vpack.c.bf16 %v953_v1, %v952_v0 }
  0xf4   : > { %v1610_v11 = vpop.f32.mrb[0].mxu1 }
  0xf5   : > { %v502_v15 = vpop.f32.mrb[1].mxu1  ;;  %v512_v30 = vmul.f32 %v1610_v11, %v2375_v16  ;;  %v923_v11 = vld [vmem:[%s2668_s6 + $0x58] sm:$0xff] }
  0xf6   : > { %v511_v17 = vmul.f32 %v502_v15, %v2349_v4  ;;  %v954_v15 = vld [vmem:[%s2668_s6 + $0x150] sm:$0xff] }
  0xf8   : > { %815 = vmatmul.mubr.f32.vlgmr.msra.gmra.mrb[2].mxu1 %v511_v17  ;;  %892 = vmatmul.mubr.f32.vlgmr.msra.gmra.mrb[0].mxu0 %v511_v17  ;;  %v955_v17 = vld [vmem:[%s2668_s6 + $0x158] sm:$0xff] }
  0xf9   : > { %820 = vmatprep.mubr.f32.mxu1 %v1950_v5  ;;  %897 = vmatprep.mubr.f32.mxu0 %v1950_v5  ;;  %v948_v5 = vld [vmem:[%s2668_s6 + $0x120] sm:$0xff]  ;;  %v1785_v24 = vpack.c.bf16 %v955_v17, %v954_v15 }
  0xfa   : > { %1734 = vmatpush3.bf16.msra.mxu1 %v1733_v18  ;;  %1766 = vmatpush3.bf16.msra.mxu0 %v1765_v19  ;;  %v1773_v44 = vpack.c.bf16 %v949_v38, %v948_v5  ;;  %v940_v18 = vld [vmem:[%s2668_s6 + $0xe0] sm:$0xff]  ;;  %v927_v5 = vld [vmem:[%s2668_s6 + $0x78] sm:$0xff] }
  0xfb   : > { %1736 = vmatprep.subr.bf16.mxu1 %v1735_v22  ;;  %1768 = vmatprep.subr.bf16.mxu0 %v1767_v23  ;;  %v973_v22 = vld [vmem:[%s2668_s6 + $0x1e8] sm:$0xff]  ;;  %v1753_v23 = vpack.c.bf16 %v923_v11, %v922_v10  ;;  %v1755_v25 = vpack.c.bf16 %v941_v20, %v940_v18 }
  0xfc   : > { %821 = vmatmul.mubr.f32.gmra.mrb[4].mxu1 %v512_v30  ;;  %898 = vmatmul.mubr.f32.gmra.mrb[2].mxu0 %v512_v30  ;;  %v1787_v28 = vpack.c.bf16 %v973_v22, %v972_v21  ;;  %v956_v30 = vld [vmem:[%s2668_s6 + $0x160] sm:$0xff] }
  0xfe   : > { %1738 = vmatpush3.bf16.msra.mxu1 %v1737_v31  ;;  %1770 = vmatpush3.bf16.msra.mxu0 %v1769_v32  ;;  %v957_v31 = vld [vmem:[%s2668_s6 + $0x168] sm:$0xff] }
  0xff   : > { %1740 = vmatprep.subr.bf16.mxu1 %v1739_v36  ;;  %1772 = vmatprep.subr.bf16.mxu0 %v1771_v37  ;;  %v1789_v32 = vpack.c.bf16 %v957_v31, %v956_v30  ;;  %v1759_v36 = vpack.c.bf16 %v943_v34, %v942_v33  ;;  %v926_v37 = vld [vmem:[%s2668_s6 + $0x70] sm:$0xff] }
 0x100   : > { %v1761_v38 = vpack.c.bf16 %v927_v5, %v926_v37  ;;  %v1243_v37 = vld [vmem:[%s2670_s8] sm:$0xff]  ;;  %v1244_v5 = vld [vmem:[%s2670_s8 + $0x8] sm:$0xff] }
 0x101   : > { %v1795_v39 = vpack.c.bf16 %v1244_v5, %v1243_v37 }
 0x102   : > { %v2453_v56 = vpop.f32.mrb[6].mxu1  ;;  %1742 = vmatpush3.bf16.msra.mxu1 %v1741_v43  ;;  %1774 = vmatpush3.bf16.msra.mxu0 %v1773_v44  ;;  %v959_v43 = vld [vmem:[%s2668_s6 + $0x178] sm:$0xff] }
 0x103   : > { %v2461_v61 = vpop.f32.mrb[7].mxu1  ;;  %1744 = vmatprep.subr.bf16.mxu1 %v1743_v48  ;;  %1776 = vmatprep.subr.bf16.mxu0 %v1775_v49  ;;  %v1793_v44 = vpack.c.bf16 %v959_v43, %v958_v42  ;;  %v1247_v42 = vld [vmem:[%s2670_s8 + $0x20] sm:$0xff]  ;;  %v1248_v43 = vld [vmem:[%s2670_s8 + $0x28] sm:$0xff] }
 0x106   : > { %1746 = vmatpush3.bf16.msra.mxu1 %v1745_v57  ;;  %1778 = vmatpush3.bf16.msra.mxu0 %v1777_v58  ;;  %v745_v12 = vpop.f32.mrb[8].mxu1 }
 0x107   : > { %1748 = vmatprep.subr.bf16.mxu1 %v1747_v62  ;;  %1780 = vmatprep.subr.bf16.mxu0 %v1779_v63  ;;  %v747_v19 = vpop.f32.mrb[9].mxu1 }
 0x10a   : > { %1750 = vmatpush3.bf16.msra.mxu1 %v1749_v8  ;;  %1782 = vmatpush3.bf16.msra.mxu0 %v1781_v9 }
 0x10b   : > { %1752 = vmatprep.subr.bf16.mxu1 %v1751_v13  ;;  %1784 = vmatprep.subr.bf16.mxu0 %v1783_v14  ;;  %v1951_v14 = vmov -inf  }
 0x10e   : > { %1754 = vmatpush3.bf16.msra.mxu1 %v1753_v23  ;;  %1786 = vmatpush3.bf16.msra.mxu0 %v1785_v24 }
 0x10f   : > { %1756 = vmatprep.subr.bf16.mxu1 %v1755_v25  ;;  %1788 = vmatprep.subr.bf16.mxu0 %v1787_v28 }
 0x112   : > { %1758 = vmatpush3.bf16.msra.mxu1 %v1757_v29  ;;  %1790 = vmatpush3.bf16.msra.mxu0 %v1789_v32 }
 0x113   : > { %1760 = vmatprep.subr.bf16.mxu1 %v1759_v36  ;;  %1792 = vmatprep.subr.bf16.mxu0 %v1791_v41  ;;  %v1159_v36 = vld [vmem:[%s2669_s7] sm:$0xff] }
 0x116   : > { %1762 = vmatpush3.bf16.msra.mxu1 %v1761_v38  ;;  %1794 = vmatpush3.bf16.msra.mxu0 %v1793_v44  ;;  %v1245_v38 = vld [vmem:[%s2670_s8 + $0x10] sm:$0xff]  ;;  %v1803_v44 = vpack.c.bf16 %v1248_v43, %v1247_v42 }
 0x117   : > { %1611 = vmatprep.subr.mxu1 %v1159_v36  ;;  %v1799_v41 = vpack.c.bf16 %v1246_v40, %v1245_v38  ;;  %1796 = vmatprep.subr.bf16.mxu0 %v1795_v39 }
 0x1cb   : > { %v816_v45 = vpop.f32.mrb[2].mxu1  ;;  %v893_v47 = vpop.f32.mrb[0].mxu0 }
 0x1cc   : > { %v894_v48 = vadd.f32 %v893_v47, %v2453_v56  ;;  %v818_v49 = vpop.f32.mrb[3].mxu1  ;;  %v895_v50 = vpop.f32.mrb[1].mxu0  ;;  %v904_v53 = vmax.f32 %v816_v45, 0.0  ;;  %v1249_v45 = vld [vmem:[%s2670_s8 + $0x30] sm:$0xff]  ;;  %v1250_v47 = vld [vmem:[%s2670_s8 + $0x38] sm:$0xff] }
 0x1cd   : > { %v905_v51 = vmax.f32 %v818_v49, 0.0  ;;  %v896_v52 = vadd.f32 %v895_v50, %v2461_v61  ;;  %v1126_v61 = vlaneseq  ;;  %v1251_v49 = vld [vmem:[%s2670_s8 + $0x40] sm:$0xff]  ;;  %v1252_v50 = vld [vmem:[%s2670_s8 + $0x48] sm:$0xff] }
 0x1ce   : > { %v906_v58 = vmax.f32 %v894_v48, 0.0  ;;  %v1807_v48 = vpack.c.bf16 %v1250_v47, %v1249_v45 }
 0x1cf   : > { %v907_v54 = vmax.f32 %v896_v52, 0.0  ;;  %v822_v55 = vpop.f32.mrb[4].mxu1  ;;  %v899_v57 = vpop.f32.mrb[2].mxu0  ;;  %1040 = vmatprep.mubr.f32.mxu1 %v905_v51  ;;  %v1127_v3 = vand.u32 127, %v1126_v61  ;;  %v1811_v51 = vpack.c.bf16 %v1252_v50, %v1251_v49  ;;  %v1253_v52 = vld [vmem:[%s2670_s8 + $0x50] sm:$0xff] }
 0x1d0   : > { %v900_v59 = vadd.f32 %v899_v57, %v745_v12  ;;  %v824_v60 = vpop.f32.mrb[5].mxu1  ;;  %v901_v62 = vpop.f32.mrb[3].mxu0  ;;  %1041 = vmatmul.mubr.f32.vlgmr.msra.gmra.mrb[10].mxu1 %v904_v53  ;;  %v908_v1 = vmax.f32 %v822_v55, 0.0  ;;  %v1254_v53 = vld [vmem:[%s2670_s8 + $0x58] sm:$0xff]  ;;  %v1255_v55 = vld [vmem:[%s2670_s8 + $0x60] sm:$0xff]  ;;  %v1256_v57 = vld [vmem:[%s2670_s8 + $0x68] sm:$0xff] }
 0x1d1   : > { %v909_v63 = vmax.f32 %v824_v60, 0.0  ;;  %v902_v0 = vadd.f32 %v901_v62, %v747_v19  ;;  %1115 = vmatprep.mubr.f32.mxu0 %v907_v54  ;;  %vm1128_vm2 = vcmp.lt.s32.totalorder %v1127_v3, 4  ;;  %1612 = vmatpush3.msra.mxu1 %v1159_v36  ;;  %v1815_v54 = vpack.c.bf16 %v1254_v53, %v1253_v52 }
 0x1d2   : > { %1116 = vmatmul.mubr.f32.vlgmr.msra.gmra.mrb[4].mxu0 %v906_v58  ;;  %v910_v2 = vmax.f32 %v900_v59, 0.0  ;;  %v1129_v15 = vsel %vm1128_vm2, -10000.0, %v1951_v14  ;;  %v1819_v58 = vpack.c.bf16 %v1256_v57, %v1255_v55 }
 0x1d3   : > { %v911_v56 = vmax.f32 %v902_v0, 0.0  ;;  %1045 = vmatprep.mubr.f32.mxu1 %v909_v63  ;;  %1798 = vmatpush3.bf16.msra.mxu0 %v1795_v39 }
 0x1d4   : > { %1046 = vmatmul.mubr.f32.gmra.mrb[12].mxu1 %v908_v1  ;;  %1800 = vmatprep.subr.bf16.mxu0 %v1799_v41 }
 0x1d5   : > { %1120 = vmatprep.mubr.f32.mxu0 %v911_v56  ;;  %v1257_v56 = vld [vmem:[%s2670_s8 + $0x70] sm:$0xff] }
 0x1d6   : > { %1121 = vmatmul.mubr.f32.gmra.mrb[6].mxu0 %v910_v2  ;;  %v1258_v2 = vld [vmem:[%s2670_s8 + $0x78] sm:$0xff] }
 0x1d7   : > { %1802 = vmatpush3.bf16.msra.mxu0 %v1799_v41  ;;  %v1823_v61 = vpack.c.bf16 %v1258_v2, %v1257_v56 }
 0x1d8   : > { %1804 = vmatprep.subr.bf16.mxu0 %v1803_v44 }
 0x1db   : > { %1806 = vmatpush3.bf16.msra.mxu0 %v1803_v44 }
 0x1dc   : > { %1808 = vmatprep.subr.bf16.mxu0 %v1807_v48 }
 0x1df   : > { %1810 = vmatpush3.bf16.msra.mxu0 %v1807_v48 }
 0x1e0   : > { %1812 = vmatprep.subr.bf16.mxu0 %v1811_v51 }
 0x1e3   : > { %1814 = vmatpush3.bf16.msra.mxu0 %v1811_v51 }
 0x1e4   : > { %1816 = vmatprep.subr.bf16.mxu0 %v1815_v54 }
 0x1e7   : > { %1818 = vmatpush3.bf16.msra.mxu0 %v1815_v54 }
 0x1e8   : > { %1820 = vmatprep.subr.bf16.mxu0 %v1819_v58 }
 0x1eb   : > { %1822 = vmatpush3.bf16.msra.mxu0 %v1819_v58 }
 0x1ec   : > { %1824 = vmatprep.subr.bf16.mxu0 %v1823_v61 }
 0x1ef   : > { %1826 = vmatpush3.bf16.msra.mxu0 %v1823_v61 }
 0x2a3   : > { %v1535_v6 = vpop.f32.mrb[10].mxu1 }
 0x2a4   : > { %v1536_v7 = vpop.f32.mrb[11].mxu1 }
 0x2a5   : > { %v1537_v8 = vadd.f32 %v1536_v7, %v1535_v6  ;;  %v1573_v9 = vpop.f32.mrb[4].mxu0 }
 0x2a6   : > { %v1574_v10 = vpop.f32.mrb[5].mxu0 }
 0x2a7   : > { %v1575_v11 = vadd.f32 %v1574_v10, %v1573_v9  ;;  %v1538_v12 = vpop.f32.mrb[12].mxu1 }
 0x2a8   : > { %v1539_v13 = vpop.f32.mrb[13].mxu1 }
 0x2a9   : > { %v1118_v17 = vadd.f32 %v1575_v11, %v1537_v8  ;;  %v1540_v18 = vadd.f32 %v1539_v13, %v1538_v12  ;;  %v1576_v19 = vpop.f32.mrb[6].mxu0 }
 0x2aa   : > { %v1577_v20 = vpop.f32.mrb[7].mxu0 }
 0x2ab   : > { %v1578_v21 = vadd.f32 %v1577_v20, %v1576_v19  ;;  %v1132_v22 = vsel %vm1130_vm3, %v1118_v17, %v1129_v15 }
 0x2ac   : > { %v1137_v23 = vsel %vm1134_vm4, %v1132_v22, -inf  ;;  %1135 = vst.msk [vmem:[%s416_s20] sm:$0xff] %vm1134_vm4, %v1132_v22 }
 0x2ad   : > { %v1123_v24 = vadd.f32 %v1578_v21, %v1540_v18  ;;  %1138 = vmax.xlane.f32.xlu0 %v1137_v23 }
 0x2af   : > { %v1133_v35 = vsel %vm1131_vm5, %v1123_v24, %v1129_v15 }
 0x2b0   : > { %v1140_v25 = vsel %vm1134_vm4, %v1133_v35, -inf  ;;  %1136 = vst.msk [vmem:[%s416_s20 + $0x8] sm:$0xff] %vm1134_vm4, %v1133_v35  ;;  %s1496_s20 = sshll.u32 %s2031_s17, 8  ;;  %s1952_s17 = smov [#allocation2]  }
 0x2b1   : > { %1141 = vmax.xlane.f32.xlu0 %v1140_v25  ;;  %s2617_s21 = scalar_lea.hbm %s2672_s10, %s1496_s20  ;;  %s1890_s11 = sshll.u32 %s1952_s17, 4  ;;  %s1891_s11 = int_to_ptr.vmem [resolvable:$false] %s1890_s11 }
 0x2b2   : > { %s1892_s28 = scalar_lea.vmem %s1891_s11, 512  ;;  %p1893_p0 = scmp.lt.s32.totalorder %s2612_s18, %s1891_s11 }
 0x2b3   : > { %p1894_p1 = scmp.lt.s32.totalorder %s1892_s28, %s1886_s0 }
 0x2b5   : > { %p1895_p2 = por %p1894_p1, %p1893_p0 }
 0x2b7   : > { %p1896_p3 = pnand %p1895_p2, %p1889_p13 }
 0x33a   : > { %v1139_v26 = vpop.xlane.xlu0 %1138 }
 0x33b   : > { %v1143_v27 = vsub.f32 %v1132_v22, %v1139_v26 }
 0x33d   : > { %v1145_v28 = vmul.f32 1.442695, %v1143_v27 }
 0x33e   : > { %v1142_v29 = vpop.xlane.xlu0 %1141 }
 0x33f   : > { %1878 = vpow2.f32 %v1145_v28  ;;  %v1144_v30 = vsub.f32 %v1133_v35, %v1142_v29 }
 0x341   : > { %v1147_v31 = vmul.f32 1.442695, %v1144_v30 }
 0x343   : > { %1880 = vpow2.f32 %v1147_v31 }
 0x349   : > { %v1879_v32 = vpop.eup %1878 }
 0x34a   : > { %v1149_v33 = vsel %vm1134_vm4, %v1879_v32, 0.0 }
 0x34b   : > { %1150 = vadd.xlane.f32.xlu1 %v1149_v33 }
 0x34d   : > { %v1881_v46 = vpop.eup %1880 }
 0x34e   : > { %v1152_v34 = vsel %vm1134_vm4, %v1881_v46, 0.0 }
 0x34f   : > { %1153 = vadd.xlane.f32.xlu1 %v1152_v34 }
 0x3d8   : > { %v1151_v59 = vpop.xlane.xlu1 %1150 }
 0x3d9   : > { %1882 = vrcp.f32 %v1151_v59 }
 0x3dc   : > { %v1154_v60 = vpop.xlane.xlu1 %1153 }
 0x3dd   : > { %1884 = vrcp.f32 %v1154_v60 }
 0x3e3   : > { %v1883_v62 = vpop.eup %1882 }
 0x3e4   : > { %v1157_v63 = vmul.f32 %v1883_v62, %v1879_v32 }
 0x3e6   : > { %1613 = vmatprep.mubr.msk.f32.mxu1 %vm1134_vm4, %v1157_v63 }
 0x3e7   : > { %v1885_v0 = vpop.eup %1884 }
 0x3e8   : > { %v1158_v1 = vmul.f32 %v1885_v0, %v1881_v46 }
 0x3ea   : > { %1614 = vmatmul.mubr.msk.f32.vlgmr.msra.gmra.mrb[14].mxu1 %vm1134_vm4, %v1158_v1 }
 0x4bd   : > { %v1615_v3 = vpop.f32.mrb[14].mxu1 }
 0x4be   : > { %v1232_v6 = vpop.f32.mrb[15].mxu1  ;;  %v1242_v8 = vmul.f32 %v1615_v3, %v2375_v16 }
 0x4bf   : > { %v1241_v7 = vmul.f32 %v1232_v6, %v2349_v4 }
 0x4c1   : > { %1648 = vmatprep.mubr.f32.mxu0 %v1241_v7 }
 0x4c2   : > { %1649 = vmatmul.mubr.f32.vlgmr.msra.gmra.mrb[8].mxu0 %v1242_v8 }
 0x595   : > { %v1650_v4 = vpop.f32.mrb[8].mxu0 }
 0x596   : > { %1335 = vst.msk [vmem:[%s393_s12 + $0x8] sm:$0xff] %vm429_vm0, %v1650_v4  ;;  %v1325_v16 = vpop.f32.mrb[9].mxu0 }
 0x597   : > { %1334 = vst.msk [vmem:[%s393_s12] sm:$0xff] %vm429_vm0, %v1325_v16 }
 0x598   : > { %1899 = shalt.err (!%p1896_p3)
}
 0x599   : > { %s1900_s3 = scalar_lea.hbm %s2617_s21, 256  ;;  %s1904_s12 = scalar_lea.hbm %s2672_s10, 512 }
 0x59a   : > { %p1901_p4 = scmp.ne.s32.totalorder %s2617_s21, %s1900_s3  ;;  %p1905_p9 = scmp.lt.u32.totalorder %s2617_s21, %s2672_s10 }
 0x59b   : > { %p1906_p10 = scmp.lt.u32.totalorder %s1904_s12, %s1900_s3  ;;  %p1908_p12 = scmp.lt.u32.totalorder %s1900_s3, %s2617_s21 }
 0x59c   : > { %p1902_p7 = pnand %p1901_p4, %p2048_p5 }
 0x59d   : > { %p1907_p11 = por %p1906_p10, %p1905_p9 }
 0x59e   : > { %p1903_p8 = pneg %p1902_p7 }
 0x59f   : > { %p1909_p13 = por %p1908_p12, %p1907_p11 }
 0x5a1   : > { %p1910_p0 = pnand %p1909_p13, %p1903_p8 }
 0x5a3   : > { %1913 = shalt.err (!%p1910_p0)
}
 0x5a4   : > { %s1953_s25 = smov 128   ;;  %s1954_s0 = smov 8  }
 0x5a5   : > { %1835 = dma.vmem_to_hbm [thread:$0]  (%p2048_p5), %s2612_s18, 256, %s2617_s21, %s2621_s26, %s1953_s25, %s1953_s25, %s1954_s0  }
 0x5a6 PF: > { %p1841_p1 = scmp.ge.s32.totalorder %s1948_s16, 2  ;;  %s1382_s17 = sand.u32 1, %s1936_s13  }
 0x5a7   : > { %s1383_s11 = scalar_lea.sflag [#allocation3], %s1382_s17 }
 0x5a8   : > { %p1838_p2 = pnand %p1841_p1, %p2052_p6 }
 0x5aa   : > { %1931 = dma.done.wait (!%p1838_p2), %s1383_s11, 256  }
 0x5ab   : > { %1933 = vsyncadd (!%p1838_p2), %s1383_s11, 4294967040  ;;  %p21_p3 = scmp.ge.s32.totalorder %s2035_s19, 4   ;;  %s2679_s13 = smov %s1940_s14 }
 0x5ac   : > { %s2680_s14 = smov %s1944_s15  ;;  %s2681_s15 = smov %s2046_s22 }
 0x5ad   : > { %s2682_s16 = smov %s2035_s19  ;;  %23 = sbr.rel (!%p21_p3) target bundleno = 6 (0x6), region = 109 }
 0x5b4   :  { %1388 = vsyncpa [#allocation3], 1 }
 0x5b5   :  { %1390 = vsyncpa [#allocation3 + $0x1], 1 }

</bundles_post_ra>
